<compile_context>
chip_gen: v7x
topology: tpu7x:2x2x1
jax: 0.10.0
libtpu: 0.0.40
codegen_flags: <defaults>
</compile_context>

<pallas_src>
import jax
import jax.numpy as jnp
from jax.experimental import pallas as pl
from jax.experimental.pallas import tpu as pltpu

EPS = 1e-5
_VMEM_LIMIT = 32 * 1024 * 1024  # safe on v5e / v6e / v7x


def _pick_c_block(c, target=64):
    """Channel block: full C, or a divisor of C that is a multiple of 8."""
    if c <= target or c % 8 != 0:
        return c
    for d in range(target, 7, -1):
        if d % 8 == 0 and c % d == 0:
            return d
    return c


def _pick_m_tile(m, c_blk, itemsize, target_bytes=2 * 1024 * 1024):
    """Lane tile: divisor of M, multiple of 128, ~2 MiB per block."""
    target = max(128, target_bytes // max(1, c_blk * itemsize))
    if m <= target:
        return m
    best128 = 0
    d = 1
    while d * d <= m:
        if m % d == 0:
            for cand in (d, m // d):
                if cand <= target and cand % 128 == 0 and cand > best128:
                    best128 = cand
        d += 1
    # No 128-aligned divisor <= target: fall back to the full lane extent so
    # the block stays lane-dense (unmasked vst) and legal.
    return best128 if best128 else m


def _stats_kernel(x_ref, sum_ref, sumsq_ref):
    """Accumulate per-channel sum and sum-of-squares (f32) across (N, M) tiles."""
    first = jnp.logical_and(pl.program_id(1) == 0, pl.program_id(2) == 0)

    @pl.when(first)
    def _():
        sum_ref[...] = jnp.zeros_like(sum_ref)
        sumsq_ref[...] = jnp.zeros_like(sumsq_ref)

    # Cast per tile (tile is small); accumulate in f32 for accuracy.
    x = x_ref[...].astype(jnp.float32)                    # (c_blk, m_tile)
    sum_ref[...] += jnp.sum(x, axis=1, keepdims=True)     # (c_blk, 1)
    sumsq_ref[...] += jnp.sum(x * x, axis=1, keepdims=True)


def _norm_kernel(x_ref, scale_ref, shift_ref, o_ref):
    """y = x * scale + shift with per-channel f32 scale/shift, cast on store."""
    o_ref[...] = (x_ref[...] * scale_ref[...] + shift_ref[...]).astype(o_ref.dtype)


def batchnorm3d(x, gamma, beta, eps=EPS):
    """x: (N, C, D, H, W); gamma/beta: (C,).  Training-mode BatchNorm3d fwd."""
    n, c, d, h, w = x.shape
    m = d * h * w
    x3 = x.reshape(n, c, m)  # free view of NCDHW, no transpose

    itemsize = jnp.dtype(x.dtype).itemsize
    c_blk = _pick_c_block(c)
    m_tile = _pick_m_tile(m, c_blk, itemsize)
    n_cb = c // c_blk
    n_mt = m // m_tile

    # ---------------- pass 1: per-channel sum / sum of squares ----------------
    sums, sumsqs = pl.pallas_call(
        _stats_kernel,
        out_shape=(
            jax.ShapeDtypeStruct((c, 1), jnp.float32),
            jax.ShapeDtypeStruct((c, 1), jnp.float32),
        ),
        grid=(n_cb, n, n_mt),
        in_specs=[
            pl.BlockSpec((None, c_blk, m_tile), lambda cb, ni, mi: (ni, cb, mi)),
        ],
        out_specs=(
            pl.BlockSpec((c_blk, 1), lambda cb, ni, mi: (cb, 0)),
            pl.BlockSpec((c_blk, 1), lambda cb, ni, mi: (cb, 0)),
        ),
        compiler_params=pltpu.CompilerParams(
            dimension_semantics=("parallel", "arbitrary", "arbitrary"),
            vmem_limit_bytes=_VMEM_LIMIT,
        ),
    )(x3)

    # -------- tiny (C,) math: fold stats + affine into scale/shift (f32) ------
    # Note: var = E[x^2] - mean^2 with f32 accumulation (standard for BN).
    count = jnp.float32(n * m)
    mean = sums / count
    var = sumsqs / count - mean * mean
    inv_std = jax.lax.rsqrt(var + jnp.float32(eps))
    scale = gamma.reshape(c, 1).astype(jnp.float32) * inv_std
    shift = beta.reshape(c, 1).astype(jnp.float32) - mean * scale

    # ---------------- pass 2: normalize, y = x * scale + shift ----------------
    out3 = pl.pallas_call(
        _norm_kernel,
        out_shape=jax.ShapeDtypeStruct((n, c, m), x.dtype),
        grid=(n_cb, n, n_mt),
        in_specs=[
            pl.BlockSpec((None, c_blk, m_tile), lambda cb, ni, mi: (ni, cb, mi)),
            pl.BlockSpec((c_blk, 1), lambda cb, ni, mi: (cb, 0)),  # scale: per-C only
            pl.BlockSpec((c_blk, 1), lambda cb, ni, mi: (cb, 0)),  # shift: per-C only
        ],
        out_specs=pl.BlockSpec((None, c_blk, m_tile), lambda cb, ni, mi: (ni, cb, mi)),
        compiler_params=pltpu.CompilerParams(
            dimension_semantics=("parallel", "parallel", "parallel"),
            vmem_limit_bytes=_VMEM_LIMIT,
        ),
    )(x3, scale, shift)

    return out3.reshape(n, c, d, h, w)


if __name__ == "__main__":
    key = jax.random.PRNGKey(0)
    N, C, D, H, W = 2, 4, 8, 8, 8
    x = jax.random.normal(key, (N, C, D, H, W), dtype=jnp.float32)

    # nn.BatchNorm3d default parameter init: weight (gamma)=1, bias (beta)=0.
    gamma = jnp.ones((C,), dtype=jnp.float32)
    beta = jnp.zeros((C,), dtype=jnp.float32)

    out = jax.block_until_ready(batchnorm3d(x, gamma, beta))

    # Pure-JAX reference (training-mode batch statistics, biased variance).
    mean = jnp.mean(x, axis=(0, 2, 3, 4), keepdims=True)
    var = jnp.var(x, axis=(0, 2, 3, 4), keepdims=True)
    ref = (x - mean) / jnp.sqrt(var + EPS) * gamma.reshape(1, C, 1, 1, 1) \
        + beta.reshape(1, C, 1, 1, 1)
    assert jnp.allclose(out, ref, atol=1e-4, rtol=1e-4), "mismatch vs reference"

    print("KERNEL_OK")
</pallas_src>

<mosaic_0001>
module attributes {stable_mosaic.version = 11 : i64} {
  func.func @_stats_kernel(%arg0: i32, %arg1: i32, %arg2: i32, %arg3: memref<1x4x512xf32, #tpu.memory_space<vmem>>, %arg4: memref<4x1xf32, #tpu.memory_space<vmem>>, %arg5: memref<4x1xf32, #tpu.memory_space<vmem>>) attributes {dimension_semantics = [#tpu.dimension_semantics<parallel>, #tpu.dimension_semantics<arbitrary>, #tpu.dimension_semantics<arbitrary>], iteration_bounds = array<i64: 1, 2, 1>, scalar_prefetch = 0 : i64, scratch_operands = 0 : i64, tpu.core_type = #tpu.core_type<tc>, window_params = [{transform_indices = @transform_0, window_bounds = array<i64: 1, 4, 512>}, {transform_indices = @transform_1, window_bounds = array<i64: 4, 1>}, {transform_indices = @transform_2, window_bounds = array<i64: 4, 1>}]} {
    %c0_i32 = arith.constant 0 : i32
    %0 = arith.cmpi eq, %arg1, %c0_i32 : i32
    %c0_i32_0 = arith.constant 0 : i32
    %1 = arith.cmpi eq, %arg2, %c0_i32_0 : i32
    %2 = arith.andi %0, %1 : i1
    %3 = arith.extui %2 : i1 to i32
    %c0_i32_1 = arith.constant 0 : i32
    %4 = arith.cmpi ne, %3, %c0_i32_1 : i32
    scf.if %4 {
      %cst_13 = arith.constant 0.000000e+00 : f32
      %18 = vector.broadcast %cst_13 : f32 to vector<4x1xf32>
      %c0_14 = arith.constant 0 : index
      %c0_15 = arith.constant 0 : index
      %19 = vector.load %arg4[%c0_14, %c0_15] : memref<4x1xf32, #tpu.memory_space<vmem>>, vector<4x1xf32>
      tpu.vector_store %arg4[%c0_14, %c0_15], %18 {strides = array<i32>} : memref<4x1xf32, #tpu.memory_space<vmem>>, vector<4x1xf32>,
      %cst_16 = arith.constant 0.000000e+00 : f32
      %20 = vector.broadcast %cst_16 : f32 to vector<4x1xf32>
      %c0_17 = arith.constant 0 : index
      %c0_18 = arith.constant 0 : index
      %21 = vector.load %arg5[%c0_17, %c0_18] : memref<4x1xf32, #tpu.memory_space<vmem>>, vector<4x1xf32>
      tpu.vector_store %arg5[%c0_17, %c0_18], %20 {strides = array<i32>} : memref<4x1xf32, #tpu.memory_space<vmem>>, vector<4x1xf32>,
    } else {
    }
    %c0 = arith.constant 0 : index
    %c0_2 = arith.constant 0 : index
    %c0_3 = arith.constant 0 : index
    %5 = vector.load %arg3[%c0, %c0_2, %c0_3] : memref<1x4x512xf32, #tpu.memory_space<vmem>>, vector<1x4x512xf32>
    %6 = vector.shape_cast %5 : vector<1x4x512xf32> to vector<4x512xf32>
    %c0_4 = arith.constant 0 : index
    %c0_5 = arith.constant 0 : index
    %7 = vector.load %arg4[%c0_4, %c0_5] : memref<4x1xf32, #tpu.memory_space<vmem>>, vector<4x1xf32>
    %cst = arith.constant dense<0.000000e+00> : vector<4xf32>
    %8 = vector.multi_reduction <add>, %6, %cst [1] : vector<4x512xf32> to vector<4xf32>
    %9 = vector.shape_cast %8 : vector<4xf32> to vector<4x1xf32>
    %10 = arith.addf %7, %9 : vector<4x1xf32>
    %c0_6 = arith.constant 0 : index
    %c0_7 = arith.constant 0 : index
    %11 = vector.load %arg4[%c0_6, %c0_7] : memref<4x1xf32, #tpu.memory_space<vmem>>, vector<4x1xf32>
    tpu.vector_store %arg4[%c0_6, %c0_7], %10 {strides = array<i32>} : memref<4x1xf32, #tpu.memory_space<vmem>>, vector<4x1xf32>,
    %c0_8 = arith.constant 0 : index
    %c0_9 = arith.constant 0 : index
    %12 = vector.load %arg5[%c0_8, %c0_9] : memref<4x1xf32, #tpu.memory_space<vmem>>, vector<4x1xf32>
    %13 = arith.mulf %6, %6 : vector<4x512xf32>
    %cst_10 = arith.constant dense<0.000000e+00> : vector<4xf32>
    %14 = vector.multi_reduction <add>, %13, %cst_10 [1] : vector<4x512xf32> to vector<4xf32>
    %15 = vector.shape_cast %14 : vector<4xf32> to vector<4x1xf32>
    %16 = arith.addf %12, %15 : vector<4x1xf32>
    %c0_11 = arith.constant 0 : index
    %c0_12 = arith.constant 0 : index
    %17 = vector.load %arg5[%c0_11, %c0_12] : memref<4x1xf32, #tpu.memory_space<vmem>>, vector<4x1xf32>
    tpu.vector_store %arg5[%c0_11, %c0_12], %16 {strides = array<i32>} : memref<4x1xf32, #tpu.memory_space<vmem>>, vector<4x1xf32>,
    return
  }
  func.func @transform_0(%arg0: i32, %arg1: i32, %arg2: i32) -> (i32, i32, i32) {
    %c0_i32 = arith.constant 0 : i32
    return %arg1, %arg0, %arg2 : i32, i32, i32
  }
  func.func @transform_1(%arg0: i32, %arg1: i32, %arg2: i32) -> (i32, i32) {
    %c0_i32 = arith.constant 0 : i32
    %c0_i32_0 = arith.constant 0 : i32
    return %arg0, %c0_i32 : i32, i32
  }
  func.func @transform_2(%arg0: i32, %arg1: i32, %arg2: i32) -> (i32, i32) {
    %c0_i32 = arith.constant 0 : i32
    %c0_i32_0 = arith.constant 0 : i32
    return %arg0, %c0_i32 : i32, i32
  }
}

</mosaic_0001>

<bundles_post_ra>
// kernel: tpu_custom_call.1
= control target key start
LH: loop header
LB: loop body
LE: loop exit
PB: predicated region body
PF: predicated region fallthrough
CT: control target
= control target key end

     0   :  { %8 = vsyncpa [#allocation3], 0  ;;  %s675_s0 = inlined_call_operand.hbm [shape: f32[2,4,512], index: 0, kind: input, shape index: {}]   ;;  %s676_s1 = inlined_call_operand.vmem [shape: f32[4,1], index: 1, kind: output, shape index: {0}]   ;;  %s677_s2 = inlined_call_operand.vmem [shape: f32[4,1], index: 2, kind: output, shape index: {1}]  }
   0x1   :  { %10 = vsyncpa [#allocation3 + $0x1], 0  ;;  %s528_s9 = smov 0   ;;  %s530_s10 = smov 0  }
   0x2   :  { %s532_s11 = smov 0   ;;  %s534_s12 = smov 0  }
   0x3   :  { %s536_s13 = smov 0   ;;  %s538_s14 = smov 0  }
   0x4 LB: > { %s356_s15 = sadd.s32 4294967295, %s509_s14   ;;  %s31_s16 = sadd.s32 1, %s505_s13  ;;  %s509_s14 = sphi %s538_s14, %s16_s14   ;;  %s505_s13 = sphi %s536_s13, %s687_s13   ;;  %s501_s12 = sphi %s534_s12, %s686_s12   ;;  %s497_s11 = sphi %s532_s11, %s685_s11   ;;  %s493_s10 = sphi %s530_s10, %s684_s10   ;;  %s489_s9 = sphi %s528_s9, %s683_s9  }
   0x5   : > { %p33_p0 = scmp.ge.s32.totalorder %s31_s16, 2  ;;  %s46_s17 = sadd.s32 1, %s497_s11 }
   0x6   : > { %p53_p1 = scmp.ne.s32.totalorder %s497_s11, %s493_s10  ;;  %p54_p2 = scmp.eq.s32.totalorder %s509_s14, 0 }
   0x7   : > { %s689_s16 = smov (%p33_p0, %s31_s16), 0  ;;  %p59_p4 = scmp.ne.s32.totalorder %s493_s10, %s489_s9 }
   0x8   : > { %p564_p3 = por %p54_p2, %p53_p1  ;;  %s39_s19 = ssub.s32 %s505_s13, %s689_s16 }
   0x9   : > { %p60_p5 = scmp.eq.s32.totalorder %s356_s15, 0  ;;  %p44_p6 = scmp.eq.s32.totalorder %s39_s19, 0 }
   0xa   : > { %p377_p8 = scmp.lt.s32.totalorder %s509_s14, 2  ;;  %s135_s22 = sand.u32 1, %s497_s11  }
   0xb   : > { %p571_p7 = por %p60_p5, %p59_p4  ;;  %s369_s23 = sshll.u32 %s505_s13, 8 }
   0xc   : > { %s577_s21 = scalar_select %p44_p6, %s497_s11, %s46_s17  }
   0xd   : > { %s359_s24 = sshll.u32 %s135_s22, 4  ;;  %s584_s27 = scalar_lea.hbm %s675_s0, %s369_s23 }
   0xe   : > { %s139_s28 = scalar_lea.vmem [#allocation2], %s359_s24  ;;  %p588_p9 = pnand %p377_p8, %p564_p3 }
   0xf   : > { %s151_s29 = sshll.u32 %s139_s28, 4  ;;  %s136_s3 = scalar_lea.sflag [#allocation3], %s135_s22  ;;  %s592_s29 = int_to_ptr.vmem [resolvable:$true] %s151_s29 }
  0x10   : > { %s429_s4 = scalar_lea.hbm %s584_s27, 256  ;;  %p431_p13 = pneg %p588_p9 }
  0x11   : > { %p430_p12 = scmp.ne.s32.totalorder %s584_s27, %s429_s4  ;;  %s434_s7 = scalar_lea.hbm %s675_s0, 512 }
  0x12   : > { %p435_p2 = scmp.lt.u32.totalorder %s584_s27, %s675_s0  ;;  %p436_p3 = scmp.lt.u32.totalorder %s434_s7, %s429_s4 }
  0x13   : > { %p432_p0 = pnand %p431_p13, %p430_p12  ;;  %p438_p5 = scmp.lt.u32.totalorder %s429_s4, %s584_s27 }
  0x14   : > { %p437_p4 = por %p436_p3, %p435_p2 }
  0x15   : > { %p433_p1 = pneg %p432_p0 }
  0x16   : > { %p439_p6 = por %p438_p5, %p437_p4 }
  0x18   : > { %p440_p8 = pnand %p439_p6, %p433_p1 }
  0x1a   : > { %443 = shalt.err (!%p440_p8)
}
  0x1b   : > { %s444_s15 = scalar_lea.vmem %s592_s29, 256  ;;  %s511_s17 = smov [#allocation2]  }
  0x1c   : > { %p445_p12 = scmp.ne.s32.totalorder %s592_s29, %s444_s15  ;;  %s449_s18 = sshll.u32 %s511_s17, 4  ;;  %s450_s18 = int_to_ptr.vmem [resolvable:$false] %s449_s18 }
  0x1d   : > { %s451_s19 = scalar_lea.vmem %s450_s18, 512  ;;  %p452_p11 = scmp.lt.s32.totalorder %s592_s29, %s450_s18 }
  0x1e   : > { %p447_p0 = pnand %p445_p12, %p431_p13  ;;  %p453_p2 = scmp.lt.s32.totalorder %s451_s19, %s444_s15 }
  0x20   : > { %p448_p10 = pneg %p447_p0  ;;  %p454_p3 = por %p453_p2, %p452_p11 }
  0x22   : > { %p455_p4 = pnand %p454_p3, %p448_p10 }
  0x24   : > { %458 = shalt.err (!%p455_p4)
}
  0x25   : > { %376 = dma.hbm_to_vmem [thread:$0]  (!%p588_p9), %s584_s27, 256, %s592_s29, %s136_s3  }
  0x26   : > { %p681_p1 = scmp.lt.s32.totalorder %s509_s14, 3  ;;  %p682_p5 = scmp.ge.s32.totalorder %s509_s14, 1 }
  0x28   : > { %p157_p13 = pnand %p682_p5, %p681_p1 }
  0x29   : > { %s162_s22 = sand.u32 (!%p157_p13), 1, %s493_s10  }
  0x2a   : > { %160 = sbr.rel (%p157_p13) target bundleno = 218 (0xda), region = 24  ;;  %s363_s23 = sshll.u32 (!%p157_p13), %s162_s22, 4 }
  0x2b   : > { %s163_s24 = scalar_lea.sflag (!%p157_p13), [#allocation3], %s162_s22  ;;  %s166_s25 = scalar_lea.vmem (!%p157_p13), [#allocation2], %s363_s23 }
  0x31   : > { %484 = dma.done.wait (%p571_p7), %s163_s24, 256  }
  0x32   : > { %486 = vsyncadd (%p571_p7), %s163_s24, 4294967040  ;;  %p199_p10 = scmp.eq.s32.totalorder %s501_s12, 0 }
  0x33   : > { %vm205_vm0 = vcmask (%p199_p10), 3072   ;;  %v512_v0 = vmov (%p199_p10), 0.0  }
  0x34   : > { %204 = sbr.rel (!%p199_p10) target bundleno = 59 (0x3b), region = 32  ;;  %206 = vst.msk [vmem:[%s676_s1] sm:$0xf] (%p199_p10), %vm205_vm0, %v512_v0  ;;  %207 = vst.msk [vmem:[%s677_s2] sm:$0xf] (%p199_p10), %vm205_vm0, %v512_v0 }
  0x3b PF: > { %v208_v1 = vld [vmem:[%s166_s25] sm:$0xff]  ;;  %v209_v2 = vld [vmem:[%s166_s25 + $0x8] sm:$0xff]  ;;  %vm217_vm1 = vcmask 1043456   ;;  %vm228_vm2 = vcmask 3072  }
  0x3c   : > { %v213_v3 = vcombine.high %v208_v1, %v208_v1  ;;  %v214_v4 = vcombine.high %v209_v2, %v209_v2  ;;  %v218_v5 = vsel %vm217_vm1, %v208_v1, 0.0  ;;  %v231_v6 = vmul.f32 %v208_v1, %v208_v1  ;;  %v210_v23 = vld [vmem:[%s676_s1] sm:$0xf] }
  0x3d   : > { %v232_v7 = vmul.f32 %v209_v2, %v209_v2  ;;  %v221_v9 = vsel %vm217_vm1, %v209_v2, 0.0  ;;  %v230_v26 = vld [vmem:[%s677_s2] sm:$0xf] }
  0x3e   : > { %v219_v8 = vsel %vm217_vm1, %v213_v3, 0.0  ;;  %v235_v11 = vcombine.high %v231_v6, %v231_v6  ;;  %v239_v13 = vsel %vm217_vm1, %v231_v6, 0.0  ;;  %v223_v14 = vsel %vm217_vm1, %v214_v4, 0.0 }
  0x3f   : > { %v220_v10 = vadd.f32 %v219_v8, %v218_v5  ;;  %v236_v12 = vcombine.high %v232_v7, %v232_v7  ;;  %v242_v17 = vsel %vm217_vm1, %v232_v7, 0.0 }
  0x40   : > { %v240_v16 = vsel %vm217_vm1, %v235_v11, 0.0 }
  0x41   : > { %v222_v15 = vadd.f32 %v221_v9, %v220_v10  ;;  %v241_v18 = vadd.f32 %v240_v16, %v239_v13  ;;  %v244_v20 = vsel %vm217_vm1, %v236_v12, 0.0 }
  0x43   : > { %v224_v19 = vadd.f32 %v223_v14, %v222_v15  ;;  %v243_v21 = vadd.f32 %v242_v17, %v241_v18 }
  0x45   : > { %225 = vadd.xlane.f32.xlu0 %v224_v19  ;;  %v245_v22 = vadd.f32 %v244_v20, %v243_v21 }
  0x49   : > { %246 = vadd.xlane.f32.xlu0 %v245_v22 }
  0xd2   : > { %v226_v24 = vpop.xlane.xlu0 %225 }
  0xd3   : > { %v227_v25 = vadd.f32 %v226_v24, %v210_v23 }
  0xd5   : > { %229 = vst.msk [vmem:[%s676_s1] sm:$0xf] %vm228_vm2, %v227_v25 }
  0xd6   : > { %v247_v27 = vpop.xlane.xlu0 %246 }
  0xd7   : > { %v248_v28 = vadd.f32 %v247_v27, %v230_v26 }
  0xd9   : > { %249 = vst.msk [vmem:[%s677_s2] sm:$0xf] %vm228_vm2, %v248_v28 }
  0xda PF: > { %s16_s14 = sadd.s32 1, %s509_s14   ;;  %s683_s9 = smov %s493_s10 }
  0xdb   : > { %p13_p7 = scmp.ge.s32.totalorder %s16_s14, 4   ;;  %s684_s10 = smov %s497_s11 }
  0xdc   : > { %s685_s11 = smov %s577_s21  ;;  %s686_s12 = smov %s505_s13 }
  0xdd   : > { %s687_s13 = smov %s689_s16  ;;  %15 = sbr.rel (!%p13_p7) target bundleno = 4 (0x4), region = 80 }
  0xe4   :  { %283 = vsyncpa [#allocation3], 1 }
  0xe5   :  { %285 = vsyncpa [#allocation3 + $0x1], 1 }

</bundles_post_ra>
